<compile_context>
chip_gen: v6e
topology: v6e:2x2x1
jax: 0.10.0
libtpu: 0.0.40
codegen_flags: <defaults>
</compile_context>

<pallas_src>
import jax
import jax.numpy as jnp
from jax.experimental import pallas as pl
from jax.experimental.pallas import tpu as pltpu

_LANE = 128
_EPS = 1e-6
_MIN_GRID_STEPS = 4          # enough steps for DMA/compute/writeback overlap (and 2 v7x TCs)
_VMEM_BLOCK_CAP = 10 << 20   # per-block VMEM cap: 4 buffers + headroom stays < 48 MiB (v7x-safe)


def _cdiv(a: int, b: int) -> int:
    return -(-a // b)


def _l2norm_kernel(x_ref, o_ref):
    # x_ref block: (TB, C, TW) in VMEM; reduction over the sublane (channel) axis, so a
    # garbage lane column (OOB tail tile) only influences its own (masked) output column.
    xf = x_ref[...].astype(jnp.float32)                      # f32 accumulation for bf16/fp8 in
    ssq = jnp.sum(xf * xf, axis=1, keepdims=True) + _EPS     # (TB, 1, TW)
    inv = jax.lax.rsqrt(ssq)                                 # EUP rsqrt on the reduced vector only
    o_ref[...] = (xf * inv).astype(o_ref.dtype)


def _default_target_block_bytes() -> int:
    # Bigger blocks on v7x amortize the ~0.35us per-grid-step cost against ~3.2 TB/s HBM;
    # v5e/v6e are already near the streaming-roofline knee at a few MiB.
    try:
        vmem = pltpu.get_tpu_info().vmem_capacity_bytes
    except Exception:  # query unavailable (e.g. CPU interpret) -> safe default
        return 8 << 20
    return 10 << 20 if vmem <= (64 << 20) else 8 << 20


def feature_l2_norm(feature: jax.Array, *, target_block_bytes: int | None = None) -> jax.Array:
    """L2-normalize over the channel dim of an NCHW tensor (matches FeatureL2Norm)."""
    if target_block_bytes is None:
        target_block_bytes = _default_target_block_bytes()

    B, C, H, W = feature.shape
    HW = H * W
    x = feature.reshape(B, C, HW)

    itemsize = jnp.dtype(x.dtype).itemsize
    sublane = max(1, 32 // itemsize)              # 8 f32 / 16 bf16 / 32 int8
    c_eff = _cdiv(C, sublane) * sublane           # sublane-padded channels (VMEM footprint)
    hbm_col_bytes = C * itemsize                  # HBM bytes per lane column per batch row
    vmem_col_bytes = c_eff * itemsize             # VMEM bytes per lane column per batch row
    # TODO(synk): for C < sublane count, packing spatial groups into the unused sublanes would
    # recover vreg/VMEM efficiency; HBM-side sizing below already uses the un-padded C.

    hw_ceil = _cdiv(HW, _LANE) * _LANE

    # ---- lane-axis tile: no divisibility requirement (cdiv grid masks the ragged tail) ----
    if HW <= _LANE:
        tw = HW                                   # block dim == full array dim: exempt from 128 rule
    else:
        tw_cols = min(target_block_bytes // max(hbm_col_bytes, 1),
                      _VMEM_BLOCK_CAP // max(vmem_col_bytes, 1))
        tw = max(_LANE, (min(tw_cols, hw_ceil) // _LANE) * _LANE)
    lane_steps = _cdiv(HW, tw)

    # Keep >= ~4 grid steps (when the lane axis can be split) so the BlockSpec pipeline
    # actually overlaps DMA and compute and both v7x TensorCores get work.
    if HW > _LANE and B * lane_steps < _MIN_GRID_STEPS:
        want = _cdiv(_MIN_GRID_STEPS, B)
        tw_alt = max(_LANE, _cdiv(_cdiv(HW, want), _LANE) * _LANE)
        tw = min(tw, tw_alt)
        lane_steps = _cdiv(HW, tw)

    if lane_steps == 1:
        tw = HW                                   # single tile: exact extent, no OOB lanes at all

    # ---- fold batch rows into the block only when one tile already covers the lane axis ----
    tb = 1
    if lane_steps == 1 and B > 1:
        blk_hbm = tw * hbm_col_bytes
        blk_vmem = tw * vmem_col_bytes
        for d in sorted((d for d in range(1, B + 1) if B % d == 0), reverse=True):
            if (d * blk_hbm <= target_block_bytes
                    and d * blk_vmem <= _VMEM_BLOCK_CAP
                    and B // d >= min(_MIN_GRID_STEPS, B)):
                tb = d
                break

    grid = (B // tb, lane_steps)
    spec = pl.BlockSpec((tb, C, tw), lambda b, w: (b, 0, w))

    block_vmem = tb * tw * vmem_col_bytes
    # 2 input + 2 output buffers (default double buffering) + headroom; block selection keeps
    # this under 48 MiB so the same tiles fit v7x's 64 MiB per-TC VMEM.
    vmem_limit = int(max(16 << 20, min(48 << 20, 4 * block_vmem + (4 << 20))))

    cost = pl.CostEstimate(
        flops=3 * B * C * HW,                 # square + reduce-add + scale
        transcendentals=B * HW,               # one rsqrt per spatial position
        bytes_accessed=2 * B * C * HW * itemsize,
    )

    out = pl.pallas_call(
        _l2norm_kernel,
        out_shape=jax.ShapeDtypeStruct((B, C, HW), x.dtype),
        grid_spec=pltpu.PrefetchScalarGridSpec(
            num_scalar_prefetch=0,
            grid=grid,
            in_specs=[spec],
            out_specs=spec,
        ),
        compiler_params=pltpu.CompilerParams(
            # TODO(synk): if an xprof trace on v7x shows one idle TensorCore, switch the
            # outer grid axis to pltpu.CORE_PARALLEL.
            dimension_semantics=("parallel", "parallel"),
            vmem_limit_bytes=vmem_limit,
        ),
        cost_estimate=cost,
    )(x)

    return out.reshape(B, C, H, W)


if __name__ == "__main__":
    key = jax.random.PRNGKey(0)
    k1, k2, k3, k4 = jax.random.split(key, 4)

    def ref_fn(f):
        f32 = f.astype(jnp.float32)
        norm = jnp.sqrt(jnp.sum(f32 ** 2, axis=1, keepdims=True) + 1e-6)
        return (f32 / norm).astype(f.dtype)

    # Primary case (mirrors the module's typical NCHW use).
    feat = jax.random.normal(k1, (2, 4, 16, 16), dtype=jnp.float32)
    out = jax.block_until_ready(feature_l2_norm(feat))
    ref = ref_fn(feat)
    assert out.shape == feat.shape and out.dtype == feat.dtype
    assert jnp.allclose(out, ref, atol=1e-6, rtol=1e-5), float(jnp.max(jnp.abs(out - ref)))

    # Ragged H*W (not a multiple of 128, > 128): exercises the masked tail tile path.
    feat2 = jax.random.normal(k2, (2, 3, 15, 20), dtype=jnp.float32)   # HW = 300
    out2 = jax.block_until_ready(feature_l2_norm(feat2))
    assert jnp.allclose(out2, ref_fn(feat2), atol=1e-6, rtol=1e-5)

    # H*W < 128: block last dim equals the full array dim (exempt from the 128 rule).
    feat3 = jax.random.normal(k3, (3, 5, 5, 7), dtype=jnp.float32)     # HW = 35
    out3 = jax.block_until_ready(feature_l2_norm(feat3))
    assert jnp.allclose(out3, ref_fn(feat3), atol=1e-6, rtol=1e-5)

    # bf16 input: verifies f32 accumulation of the sum-of-squares inside the kernel.
    feat4 = jax.random.normal(k4, (2, 4, 16, 16), dtype=jnp.float32).astype(jnp.bfloat16)
    out4 = jax.block_until_ready(feature_l2_norm(feat4))
    assert out4.dtype == jnp.bfloat16
    assert jnp.allclose(out4.astype(jnp.float32), ref_fn(feat4).astype(jnp.float32), atol=2e-2)

    print("KERNEL_OK")
</pallas_src>

<mosaic_0001>
module attributes {stable_mosaic.version = 11 : i64} {
  func.func @_l2norm_kernel(%arg0: i32, %arg1: i32, %arg2: memref<1x4x128xf32, #tpu.memory_space<vmem>>, %arg3: memref<1x4x128xf32, #tpu.memory_space<vmem>>) attributes {dimension_semantics = [#tpu.dimension_semantics<parallel>, #tpu.dimension_semantics<parallel>], iteration_bounds = array<i64: 2, 2>, scalar_prefetch = 0 : i64, scratch_operands = 0 : i64, tpu.core_type = #tpu.core_type<tc>, window_params = [{transform_indices = @transform_0, window_bounds = array<i64: 1, 4, 128>}, {transform_indices = @transform_1, window_bounds = array<i64: 1, 4, 128>}]} {
    %c0 = arith.constant 0 : index
    %c0_0 = arith.constant 0 : index
    %c0_1 = arith.constant 0 : index
    %0 = vector.load %arg2[%c0, %c0_0, %c0_1] : memref<1x4x128xf32, #tpu.memory_space<vmem>>, vector<1x4x128xf32>
    %1 = arith.mulf %0, %0 : vector<1x4x128xf32>
    %cst = arith.constant dense<0.000000e+00> : vector<1x128xf32>
    %2 = vector.multi_reduction <add>, %1, %cst [1] : vector<1x4x128xf32> to vector<1x128xf32>
    %3 = vector.shape_cast %2 : vector<1x128xf32> to vector<1x1x128xf32>
    %cst_2 = arith.constant 9.99999997E-7 : f32
    %4 = vector.broadcast %cst_2 : f32 to vector<1x1x128xf32>
    %5 = arith.addf %3, %4 : vector<1x1x128xf32>
    %6 = math.rsqrt %5 : vector<1x1x128xf32>
    %7 = vector.broadcast %6 : vector<1x1x128xf32> to vector<1x4x128xf32>
    %8 = arith.mulf %0, %7 : vector<1x4x128xf32>
    %c0_3 = arith.constant 0 : index
    %c0_4 = arith.constant 0 : index
    %c0_5 = arith.constant 0 : index
    %9 = vector.load %arg3[%c0_3, %c0_4, %c0_5] : memref<1x4x128xf32, #tpu.memory_space<vmem>>, vector<1x4x128xf32>
    tpu.vector_store %arg3[%c0_3, %c0_4, %c0_5], %8 {strides = array<i32>} : memref<1x4x128xf32, #tpu.memory_space<vmem>>, vector<1x4x128xf32>,
    return
  }
  func.func @transform_0(%arg0: i32, %arg1: i32) -> (i32, i32, i32) {
    %c0_i32 = arith.constant 0 : i32
    %c0_i32_0 = arith.constant 0 : i32
    return %arg0, %c0_i32, %arg1 : i32, i32, i32
  }
  func.func @transform_1(%arg0: i32, %arg1: i32) -> (i32, i32, i32) {
    %c0_i32 = arith.constant 0 : i32
    %c0_i32_0 = arith.constant 0 : i32
    return %arg0, %c0_i32, %arg1 : i32, i32, i32
  }
}

</mosaic_0001>

<bundles_post_ra>
// kernel: tpu_custom_call.1
= control target key start
LH: loop header
LB: loop body
LE: loop exit
PB: predicated region body
PF: predicated region fallthrough
CT: control target
= control target key end

     0   :  { %6 = vsyncpa [#allocation3], 0  ;;  %s654_s0 = inlined_call_operand.hbm [shape: f32[2,4,256], index: 0, kind: input, shape index: {}]   ;;  %s655_s1 = inlined_call_operand.hbm [shape: f32[2,4,256], index: 1, kind: output, shape index: {}]  }
   0x1   :  { %8 = vsyncpa [#allocation3 + $0x1], 0 }
   0x2   :  { %9 = vsyncpa [#allocation4], 0 }
   0x3   :  { %11 = vsyncpa [#allocation4 + $0x1], 0  ;;  %s498_s6 = smov 0   ;;  %s500_s7 = smov 0  }
   0x4   :  { %s502_s8 = smov 0   ;;  %s504_s9 = smov 0  }
   0x5   :  { %s506_s10 = smov 0   ;;  %s508_s11 = smov 0  }
   0x6   :  { %s510_s12 = smov 0   ;;  %s512_s13 = smov 0  }
   0x7 LB: > { %s265_s14 = sadd.s32 4294967295, %s484_s13   ;;  %s266_s15 = sadd.s32 4294967294, %s484_s13   ;;  %s484_s13 = sphi %s512_s13, %s17_s13   ;;  %s480_s12 = sphi %s510_s12, %s668_s12   ;;  %s476_s11 = sphi %s508_s11, %s667_s11   ;;  %s472_s10 = sphi %s506_s10, %s666_s10   ;;  %s468_s9 = sphi %s504_s9, %s665_s9   ;;  %s464_s8 = sphi %s502_s8, %s664_s8   ;;  %s460_s7 = sphi %s500_s7, %s663_s7   ;;  %s456_s6 = sphi %s498_s6, %s662_s6  }
   0x8   : > { %s26_s16 = sadd.s32 1, %s476_s11  ;;  %s29_s17 = sadd.s32 1, %s480_s12 }
   0x9   : > { %p27_p0 = scmp.ge.s32.totalorder %s26_s16, 2  ;;  %s38_s18 = sadd.s32 1, %s464_s8 }
   0xa   : > { %p45_p1 = scmp.ne.s32.totalorder %s464_s8, %s460_s7  ;;  %p46_p2 = scmp.eq.s32.totalorder %s484_s13, 0 }
   0xb   : > { %s670_s16 = smov (%p27_p0, %s26_s16), 0  ;;  %s672_s17 = smov (!%p27_p0, %s29_s17), %s480_s12 }
   0xc   : > { %s34_s19 = ssub.s32 %s476_s11, %s670_s16  ;;  %p551_p3 = por %p46_p2, %p45_p1 }
   0xd   : > { %p31_p4 = scmp.ge.s32.totalorder %s672_s17, 2  ;;  %p51_p5 = scmp.ne.s32.totalorder %s460_s7, %s456_s6 }
   0xe   : > { %p52_p6 = scmp.eq.s32.totalorder %s265_s14, 0  ;;  %p77_p7 = scmp.eq.s32.totalorder %s265_s14, 3 }
   0xf   : > { %s674_s17 = smov (%p31_p4, %s672_s17), 0  ;;  %p83_p10 = scmp.eq.s32.totalorder %s266_s15, 3 }
  0x10   : > { %p559_p8 = por %p52_p6, %p51_p5  ;;  %p563_p9 = por %p77_p7, %p45_p1 }
  0x11   : > { %s33_s23 = ssub.s32 %s480_s12, %s674_s17  ;;  %p569_p12 = por %p83_p10, %p51_p5 }
  0x12   : > { %s35_s24 = sor.u32 %s34_s19, %s33_s23  ;;  %p292_p13 = scmp.lt.s32.totalorder %s484_s13, 4 }
  0x13   : > { %p36_p11 = scmp.eq.s32.totalorder %s35_s24, 0  ;;  %s103_s26 = sand.u32 1, %s464_s8  }
  0x14   : > { %s659_s25 = scalar_select %p569_p12, 1, 0 }
  0x15   : > { %s576_s27 = scalar_select %p36_p11, %s464_s8, %s38_s18  }
  0x16   : > { %s269_s28 = sshll.u32 %s103_s26, 2  ;;  %s270_s29 = sshll.u32 %s480_s12, 1 }
  0x17   : > { %s112_s30 = sadd.s32 %s476_s11, %s270_s29  ;;  %s107_s2 = scalar_lea.vmem [#allocation2], %s269_s28 }
  0x18   : > { %s116_s3 = sshll.u32 %s107_s2, 4  ;;  %s271_s4 = sshll.u32 %s112_s30, 6  ;;  %s117_s3 = int_to_ptr.vmem [resolvable:$true] %s116_s3 }
  0x19   : > { %s114_s15 = scalar_lea.hbm %s654_s0, %s271_s4  ;;  %p585_p0 = pnand %p292_p13, %p551_p3 }
  0x1a   : > { %p272_p1 = scmp.ge.s32.totalorder %s484_s13, 1  ;;  %p121_p2 = scmp.lt.s32.totalorder %s484_s13, 5 }
  0x1b   : > { %s104_s18 = scalar_lea.sflag [#allocation3], %s103_s26  ;;  %p362_p4 = pneg %p585_p0 }
  0x1c   : > { %s373_s23 = scalar_lea.vmem %s117_s3, 64  ;;  %s486_s24 = smov [#allocation2]  }
  0x1d   : > { %p374_p5 = scmp.ne.s32.totalorder %s117_s3, %s373_s23  ;;  %s378_s28 = sshll.u32 %s486_s24, 4  ;;  %s379_s28 = int_to_ptr.vmem [resolvable:$false] %s378_s28 }
  0x1e   : > { %s380_s29 = scalar_lea.vmem %s379_s28, 128  ;;  %p381_p10 = scmp.lt.s32.totalorder %s117_s3, %s379_s28 }
  0x1f   : > { %p376_p6 = pnand %p374_p5, %p362_p4  ;;  %p382_p11 = scmp.lt.s32.totalorder %s380_s29, %s373_s23 }
  0x21   : > { %p377_p7 = pneg %p376_p6  ;;  %p383_p3 = por %p382_p11, %p381_p10 }
  0x23   : > { %p384_p13 = pnand %p383_p3, %p377_p7 }
  0x25   : > { %387 = shalt.err (!%p384_p13)
}
  0x26   : > { %287 = dma.hbm_to_vmem [thread:$0]  (!%p585_p0), %s114_s15, 64, %s117_s3, %s104_s18  }
  0x27   : > { %p122_p12 = pnand %p272_p1, %p121_p2 }
  0x28   : > { %s600_s20 = sand.u32 (!%p122_p12), 1, %s460_s7  }
  0x29   : > { %125 = sbr.rel (%p122_p12) target bundleno = 94 (0x5e), region = 24  ;;  %s273_s26 = sshll.u32 (!%p122_p12), %s600_s20, 2 }
  0x2a   : > { %s128_s30 = scalar_lea.sflag (!%p122_p12), [#allocation3], %s600_s20  ;;  %s131_s2 = scalar_lea.vmem (!%p122_p12), [#allocation2], %s273_s26 }
  0x2e   : > { %447 = dma.done.wait (%p559_p8), %s128_s30, 64  }
  0x2f   : > { %449 = vsyncadd (%p559_p8), %s128_s30, 4294967232  ;;  %v150_v0 = vld [vmem:[%s131_s2] sm:$0xf]  ;;  %vm152_vm0 = vcmask 1043456   ;;  %s276_s3 = sshll.u32 %s472_s10, 1  ;;  %s149_s21 = scalar_lea.vmem [#allocation5], %s273_s26 }
  0x30   : > { %v151_v1 = vmul.f32 %v150_v0, %v150_v0  ;;  %s176_s4 = sadd.s32 %s468_s9, %s276_s3  ;;  %s180_s5 = sshll.u32 %s149_s21, 4  ;;  %s181_s5 = int_to_ptr.vmem [resolvable:$true] %s180_s5 }
  0x31   : > { %s277_s14 = sshll.u32 %s176_s4, 6  ;;  %s165_s23 = scalar_lea.sflag [#allocation4], %s600_s20 }
  0x32   : > { %v153_v2 = vsel %vm152_vm0, %v151_v1, 0.0  ;;  %s178_s18 = scalar_lea.hbm %s655_s1, %s277_s14  ;;  %s388_s24 = scalar_lea.vmem %s181_s5, 64 }
  0x33   : > { %v154_v3 = vrot.slane %v153_v2, 4  ;;  %p389_p8 = scmp.ne.s32.totalorder %s181_s5, %s388_s24  ;;  %s487_s28 = smov [#allocation5]  }
  0x34   : > { %s392_s10 = sshll.u32 %s487_s28, 4  ;;  %s393_s10 = int_to_ptr.vmem [resolvable:$false] %s392_s10 }
  0x35   : > { %v155_v4 = vadd.f32 %v154_v3, %v153_v2  ;;  %p390_p12 = pnand %p389_p8, %p563_p9  ;;  %s394_s9 = scalar_lea.vmem %s393_s10, 128 }
  0x36   : > { %p395_p1 = scmp.lt.s32.totalorder %s181_s5, %s393_s10  ;;  %p396_p2 = scmp.lt.s32.totalorder %s394_s9, %s388_s24 }
  0x37   : > { %v156_v5 = vrot.slane %v155_v4, 2  ;;  %p391_p0 = pneg %p390_p12 }
  0x38   : > { %p397_p4 = por %p396_p2, %p395_p1 }
  0x39   : > { %v157_v6 = vadd.f32 %v156_v5, %v155_v4 }
  0x3a   : > { %p398_p5 = pnand %p397_p4, %p391_p0 }
  0x3b   : > { %v158_v7 = vrot.slane %v157_v6, 1 }
  0x3d   : > { %v159_v8 = vadd.f32 %v158_v7, %v157_v6 }
  0x3f   : > { %v160_v9 = vadd.f32 1e-06, %v159_v8 }
  0x41   : > { %358 = vrsqrt.f32 %v160_v9 }
  0x4e   : > { %v359_v10 = vpop.eup %358 }
  0x4f   : > { %v162_v11 = vmul.f32 %v359_v10, %v150_v0 }
  0x51   : > { %163 = vst [vmem:[%s149_s21] sm:$0xf] %v162_v11 }
  0x52   : > { %401 = shalt.err (!%p398_p5)
}
  0x53   : > { %s402_s29 = scalar_lea.hbm %s178_s18, 64  ;;  %s406_s30 = scalar_lea.hbm %s655_s1, 256 }
  0x54   : > { %p403_p6 = scmp.ne.s32.totalorder %s178_s18, %s402_s29  ;;  %p407_p11 = scmp.lt.s32.totalorder %s178_s18, %s655_s1 }
  0x55   : > { %p408_p3 = scmp.lt.s32.totalorder %s406_s30, %s402_s29 }
  0x56   : > { %p404_p7 = pnand %p403_p6, %p563_p9 }
  0x57   : > { %p409_p13 = por %p408_p3, %p407_p11 }
  0x58   : > { %p405_p10 = pneg %p404_p7 }
  0x5a   : > { %p410_p8 = pnand %p409_p13, %p405_p10 }
  0x5c   : > { %413 = shalt.err (!%p410_p8)
}
  0x5d   : > { %282 = dma.vmem_to_hbm [thread:$0]  (%p563_p9), %s181_s5, 64, %s178_s18, %s165_s23  }
  0x5e PF: > { %p293_p12 = scmp.ge.s32.totalorder %s484_s13, 2  ;;  %s192_s4 = sand.u32 1, %s456_s6  }
  0x5f   : > { %p661_p0 = scmp.ne.s32.totalorder %s659_s25, 0  ;;  %s193_s21 = scalar_lea.sflag [#allocation4], %s192_s4 }
  0x61   : > { %p289_p1 = pnand %p293_p12, %p661_p0 }
  0x63   : > { %p290_p2 = pneg %p289_p1 }
  0x65   : > { %451 = dma.done.wait (%p290_p2), %s193_s21, 64  }
  0x66   : > { %453 = vsyncadd (%p290_p2), %s193_s21, 4294967232  ;;  %s17_s13 = sadd.s32 1, %s484_s13   ;;  %s662_s6 = smov %s460_s7 }
  0x67   : > { %p14_p4 = scmp.ge.s32.totalorder %s17_s13, 6   ;;  %s663_s7 = smov %s464_s8 }
  0x68   : > { %s664_s8 = smov %s576_s27  ;;  %s665_s9 = smov %s476_s11 }
  0x69   : > { %s666_s10 = smov %s480_s12  ;;  %s667_s11 = smov %s670_s16 }
  0x6a   : > { %s668_s12 = smov %s674_s17  ;;  %16 = sbr.rel (!%p14_p4) target bundleno = 7 (0x7), region = 69 }
  0x6f   :  { %198 = vsyncpa [#allocation3], 1 }
  0x70   :  { %200 = vsyncpa [#allocation3 + $0x1], 1 }
  0x71   :  { %201 = vsyncpa [#allocation4], 1 }
  0x72   :  { %203 = vsyncpa [#allocation4 + $0x1], 1 }

</bundles_post_ra>
